<compile_context>
chip_gen: v5e
topology: v5e:2x2
jax: 0.10.0
libtpu: 0.0.40
codegen_flags: <defaults>
</compile_context>

<pallas_src>
import functools

import jax
import jax.numpy as jnp
from jax import lax
from jax.experimental import pallas as pl
from jax.experimental.pallas import tpu as pltpu


def _vmem_capacity_bytes():
    try:
        return int(pltpu.get_tpu_info().vmem_capacity_bytes)
    except Exception:  # pragma: no cover - conservative fallback
        return 64 << 20


def _pick_col_chunk(H, W, budget_bytes):
    """Largest divisor Wc of W such that the per-band intermediates
    (two (H,Wc) bf16 one-hots + ~6 (W,Wc) f32 tiles) fit the budget."""
    per_col = 4 * H + 24 * W
    max_wc = max(1, budget_bytes // per_col)
    best = 1
    for d in range(1, W + 1):
        if W % d == 0 and d <= max_wc:
            best = d
    return best


def _path_laplacian(n):
    """1-D path-graph Laplacian (gradient of sum of squared forward diffs)."""
    L = (2.0 * jnp.eye(n, dtype=jnp.float32)
         - jnp.eye(n, k=1, dtype=jnp.float32)
         - jnp.eye(n, k=-1, dtype=jnp.float32))
    L = L.at[0, 0].set(1.0)
    L = L.at[n - 1, n - 1].set(1.0)
    return L


# -----------------------------------------------------------------------------
# Fused kernel: bilinear warp + loss gradient + Adam update, one grid step per
# (batch element, Adam iteration).
# -----------------------------------------------------------------------------
def _finetune_kernel(scale_ref, srcT_ref, tgt_ref, field0_ref, lh_ref, lw_ref,
                     out_ref,
                     fx_ref, fy_ref, mx_ref, my_ref, vx_ref, vy_ref,
                     out_s, ddx_s, ddy_s,
                     *, H, W, Wc, crop, wd, b1, b2, eps):
    f32 = jnp.float32
    bf16 = jnp.bfloat16
    it = pl.program_id(1)
    n_iter = pl.num_programs(1)
    ncb = W // Wc
    inv_nsim = 2.0 / float((H - 2 * crop) * (W - 2 * crop))

    # --- iteration 0 of each batch element: load field, zero Adam state -----
    @pl.when(it == 0)
    def _init():
        z = jnp.zeros((H, W), f32)
        fx_ref[...] = field0_ref[0, 0]
        fy_ref[...] = field0_ref[0, 1]
        mx_ref[...] = z
        my_ref[...] = z
        vx_ref[...] = z
        vy_ref[...] = z

    srcT = srcT_ref[0]                                    # (W, H) bf16
    # Hoisted iotas (JAX does not CSE broadcast_in_dim inside the loop).
    rH = lax.broadcasted_iota(jnp.int32, (H, Wc), 0)
    rW = lax.broadcasted_iota(jnp.int32, (W, Wc), 0)
    x_iota = lax.broadcasted_iota(jnp.int32, (1, Wc), 1)

    # --- bilinear warp + d(out)/d(xs, ys), one (1, Wc) row band per step -----
    #   out[p]      = sum_{r,c} src[r,c] * Wy[r,p] * Wx[c,p]   (zero padding)
    # restructured so the MXU only sees exact 0/1 one-hots in bf16:
    #   T0 = srcT @ 1[r==y0],  T1 = srcT @ 1[r==y0+1]   (f32 accumulation)
    #   tmp = T0 + wy*(T1-T0); masked sublane reduce gathers column x0/x0+1.
    def band(r, c0):
        dx = fx_ref[pl.ds(r, 1), pl.ds(c0, Wc)]           # (1, Wc)
        dy = fy_ref[pl.ds(r, 1), pl.ds(c0, Wc)]
        xs = (x_iota + c0).astype(f32) + dx               # sample positions
        ys = r.astype(f32) + dy
        x0f = jnp.floor(xs)
        y0f = jnp.floor(ys)
        wx = xs - x0f
        wy = ys - y0f
        x0 = x0f.astype(jnp.int32)
        y0 = y0f.astype(jnp.int32)

        hy0 = (rH == y0).astype(bf16)                     # exact 0/1, (H, Wc)
        hy1 = (rH == y0 + 1).astype(bf16)
        t0 = jnp.dot(srcT, hy0, preferred_element_type=f32)   # (W, Wc) MXU
        t1 = jnp.dot(srcT, hy1, preferred_element_type=f32)   # (W, Wc) MXU
        dT = t1 - t0
        tmp = t0 + wy * dT                                # blended over y

        eq0 = rW == x0                                    # (W, Wc) bool
        eq1 = rW == x0 + 1
        s0 = jnp.sum(jnp.where(eq0, tmp, 0.0), axis=0, keepdims=True)
        s1 = jnp.sum(jnp.where(eq1, tmp, 0.0), axis=0, keepdims=True)
        d0 = jnp.sum(jnp.where(eq0, dT, 0.0), axis=0, keepdims=True)
        d1 = jnp.sum(jnp.where(eq1, dT, 0.0), axis=0, keepdims=True)

        out_s[pl.ds(r, 1), pl.ds(c0, Wc)] = s0 + wx * (s1 - s0)
        ddx_s[pl.ds(r, 1), pl.ds(c0, Wc)] = s1 - s0           # d out / d xs
        ddy_s[pl.ds(r, 1), pl.ds(c0, Wc)] = d0 + wx * (d1 - d0)  # d out / d ys

    if ncb == 1:
        @pl.loop(0, H)
        def _rows(r):
            band(r, 0)
    else:
        @pl.loop(0, H)
        def _rows(r):
            @pl.loop(0, ncb)
            def _cols(j):
                band(r, pl.multiple_of(j * Wc, Wc))

    # --- similarity: MSE on the border-cropped interior (2-D, sublane dense) -
    tgt = tgt_ref[0]                                      # (H, W)
    yg = lax.broadcasted_iota(jnp.int32, (H, W), 0)
    xg = lax.broadcasted_iota(jnp.int32, (H, W), 1)
    cmask = ((xg >= crop) & (xg < W - crop) &
             (yg >= crop) & (yg < H - crop)).astype(f32)
    dL = (inv_nsim * cmask) * (out_s[...] - tgt)          # dMSE/d(pred_tgt)

    lh = lh_ref[...]          # (H, H)  (2*sm/n_sm) * path Laplacian (rows)
    lw = lw_ref[...]          # (W, W)  (2*sm/n_sm) * path Laplacian (cols)

    s1c = scale_ref[2 * it]        # lr / (1 - b1**t)
    s2c = scale_ref[2 * it + 1]    # 1 / sqrt(1 - b2**t)
    last = it == n_iter - 1

    # --- per-channel gradient + Adam update ----------------------------------
    def adam_step(f_ref, m_ref, v_ref, dwarp, out_ch):
        f = f_ref[...]
        # smoothness gradient == 2*(gx[p-1]-gx[p] + gy[p-W]-gy[p]) rewritten as
        # two small matmuls against pre-scaled 1-D Laplacians (exactly equal).
        g_sm = (jnp.dot(f, lw, preferred_element_type=f32)
                + jnp.dot(lh, f, preferred_element_type=f32))
        g = dL * dwarp + g_sm + wd * f                    # wd: Adam L2-in-grad
        m = b1 * m_ref[...] + (1.0 - b1) * g
        v = b2 * v_ref[...] + (1.0 - b2) * g * g
        m_ref[...] = m
        v_ref[...] = v
        f_new = f - (m * s1c) * pl.reciprocal(jnp.sqrt(v) * s2c + eps,
                                              approx=True)
        f_ref[...] = f_new

        @pl.when(last)
        def _store():
            out_ref[0, out_ch] = f_new

    adam_step(fx_ref, mx_ref, vx_ref, ddx_s[...], 0)
    adam_step(fy_ref, my_ref, vy_ref, ddy_s[...], 1)


def _build_finetune_call(B, H, W, num_iter, Wc, *, crop, wd, b1, b2, eps,
                         vmem_limit_bytes):
    kernel = functools.partial(
        _finetune_kernel, H=H, W=W, Wc=Wc, crop=int(crop), wd=float(wd),
        b1=float(b1), b2=float(b2), eps=float(eps))

    grid_spec = pltpu.PrefetchScalarGridSpec(
        num_scalar_prefetch=1,                 # Adam bias-correction scalars
        grid=(B, num_iter),
        in_specs=[
            pl.BlockSpec((1, W, H), lambda b, it, sc: (b, 0, 0)),        # src^T (bf16)
            pl.BlockSpec((1, H, W), lambda b, it, sc: (b, 0, 0)),        # tgt
            pl.BlockSpec((1, 2, H, W), lambda b, it, sc: (b, 0, 0, 0)),  # initial field
            pl.BlockSpec((H, H), lambda b, it, sc: (0, 0)),              # Lh
            pl.BlockSpec((W, W), lambda b, it, sc: (0, 0)),              # Lw
        ],
        out_specs=pl.BlockSpec((1, 2, H, W), lambda b, it, sc: (b, 0, 0, 0)),
        scratch_shapes=[pltpu.VMEM((H, W), jnp.float32)] * 9,
        # fx, fy, mx, my, vx, vy, warp out, d/dx, d/dy
    )
    return pl.pallas_call(
        kernel,
        out_shape=jax.ShapeDtypeStruct((B, 2, H, W), jnp.float32),
        grid_spec=grid_spec,
        compiler_params=pltpu.CompilerParams(
            dimension_semantics=("parallel", "arbitrary"),
            vmem_limit_bytes=int(vmem_limit_bytes)),
    )


# -----------------------------------------------------------------------------
# finetune: fixed-LR Adam loop, fully fused inside one Pallas kernel
# -----------------------------------------------------------------------------
@functools.partial(jax.jit,
                   static_argnames=("lr", "sm", "num_iter", "crop", "wd"))
def finetune_pallas(src_img, tgt_img, pred_res, *, lr, sm, num_iter, crop,
                    wd=1e-3):
    B, _, H, W = src_img.shape
    field0 = pred_res.astype(jnp.float32)                 # (B, 2, H, W)
    if num_iter <= 0:
        return field0

    # Guard: keep the cropped interior non-empty (avoids divide by zero).
    crop = max(0, min(int(crop), (H - 1) // 2, (W - 1) // 2))

    vmem_cap = _vmem_capacity_bytes()
    chunk_budget = max(2 << 20, min(8 << 20, vmem_cap // 8))
    Wc = _pick_col_chunk(H, W, chunk_budget)

    hw = H * W
    est = (4 * hw + 8 * hw + 16 * hw + 16 * hw + 36 * hw
           + 8 * (H * H + W * W) + (4 * H + 24 * W) * Wc)
    vmem_limit = int(min(vmem_cap, max(est + (8 << 20), 32 << 20)))

    # bf16 MXU operands: source in bf16, one-hots are exact in bf16.
    srcT = jnp.transpose(src_img[:, 0].astype(jnp.float32),
                         (0, 2, 1)).astype(jnp.bfloat16)  # (B, W, H)
    tgt = tgt_img[:, 0].astype(jnp.float32)               # (B, H, W)

    # Smoothness-gradient Laplacians, pre-scaled by 2*sm / (2*H*W).
    coef = 2.0 * float(sm) / float(2 * H * W)
    Lh = coef * _path_laplacian(H)
    Lw = coef * _path_laplacian(W)

    b1, b2, eps = 0.9, 0.999, 1e-8
    t = jnp.arange(1, num_iter + 1, dtype=jnp.float32)
    adam_scale = jnp.stack([float(lr) / (1.0 - b1 ** t),
                            1.0 / jnp.sqrt(1.0 - b2 ** t)],
                           axis=1).reshape(-1)            # (2*num_iter,)

    step_fn = _build_finetune_call(B, H, W, num_iter, Wc,
                                   crop=crop, wd=wd, b1=b1, b2=b2, eps=eps,
                                   vmem_limit_bytes=vmem_limit)
    return step_fn(adam_scale, srcT, tgt, field0, Lh, Lw)


# -----------------------------------------------------------------------------
# Model (JAX / Pallas equivalent of the PyTorch module)
# -----------------------------------------------------------------------------
class Model:
    def __init__(self, lr, sm, downs_count, num_iter, crop,
                 sm_keys_to_apply=None, mse_keys_to_apply=None):
        # No learnable parameters — only hyperparameters of the finetune loop.
        self.lr = float(lr)
        self.sm = float(sm)
        self.downs_count = downs_count
        self.num_iter = int(num_iter)
        self.crop = int(crop)

    def __call__(self, src_img, tgt_img, pred_res,
                 src_defects=None, tgt_defects=None, **kwargs):
        # TODO(synk): defect-mask handling of unsupervised_loss not modeled.
        if pred_res.shape[1] != 2 and pred_res.shape[3] == 2:
            pred_res = jnp.transpose(pred_res, (0, 3, 1, 2))   # NHWC -> NCHW
        return finetune_pallas(src_img, tgt_img, pred_res,
                               lr=self.lr, sm=self.sm,
                               num_iter=self.num_iter, crop=self.crop)


if __name__ == "__main__":
    key = jax.random.PRNGKey(0)
    B, H, W = 2, 16, 16
    k1, k2, k3 = jax.random.split(key, 3)
    src_img = jax.random.uniform(k1, (B, 1, H, W), jnp.float32)
    tgt_img = jax.random.uniform(k2, (B, 1, H, W), jnp.float32)
    # field given channels-last, like one of the accepted PyTorch layouts
    pred_res = 0.5 * jax.random.normal(k3, (B, H, W, 2), jnp.float32)

    model = Model(lr=0.1, sm=1e-2, downs_count=0, num_iter=5, crop=2,
                  sm_keys_to_apply={}, mse_keys_to_apply={})
    out = jax.block_until_ready(model(src_img, tgt_img, pred_res))
    assert out.shape == (B, 2, H, W)
    assert bool(jnp.all(jnp.isfinite(out)))
    print("KERNEL_OK")
</pallas_src>

<mosaic_0001>
module attributes {stable_mosaic.version = 11 : i64} {
  func.func @_finetune_kernel(%arg0: i32, %arg1: i32, %arg2: memref<10xf32, #tpu.memory_space<smem>>, %arg3: memref<1x16x16xbf16, #tpu.memory_space<vmem>>, %arg4: memref<1x16x16xf32, #tpu.memory_space<vmem>>, %arg5: memref<1x2x16x16xf32, #tpu.memory_space<vmem>>, %arg6: memref<16x16xf32, #tpu.memory_space<vmem>>, %arg7: memref<16x16xf32, #tpu.memory_space<vmem>>, %arg8: memref<1x2x16x16xf32, #tpu.memory_space<vmem>>, %arg9: memref<16x16xf32, #tpu.memory_space<vmem>>, %arg10: memref<16x16xf32, #tpu.memory_space<vmem>>, %arg11: memref<16x16xf32, #tpu.memory_space<vmem>>, %arg12: memref<16x16xf32, #tpu.memory_space<vmem>>, %arg13: memref<16x16xf32, #tpu.memory_space<vmem>>, %arg14: memref<16x16xf32, #tpu.memory_space<vmem>>, %arg15: memref<16x16xf32, #tpu.memory_space<vmem>>, %arg16: memref<16x16xf32, #tpu.memory_space<vmem>>, %arg17: memref<16x16xf32, #tpu.memory_space<vmem>>) attributes {dimension_semantics = [#tpu.dimension_semantics<parallel>, #tpu.dimension_semantics<arbitrary>], iteration_bounds = array<i64: 2, 5>, scalar_prefetch = 1 : i64, scratch_operands = 9 : i64, tpu.core_type = #tpu.core_type<tc>, window_params = [{transform_indices = @transform_0, window_bounds = array<i64: 1, 16, 16>}, {transform_indices = @transform_1, window_bounds = array<i64: 1, 16, 16>}, {transform_indices = @transform_2, window_bounds = array<i64: 1, 2, 16, 16>}, {pipeline_mode = #tpu.pipeline_mode<synchronous>, transform_indices = @transform_3, window_bounds = array<i64: 16, 16>}, {pipeline_mode = #tpu.pipeline_mode<synchronous>, transform_indices = @transform_4, window_bounds = array<i64: 16, 16>}, {transform_indices = @transform_5, window_bounds = array<i64: 1, 2, 16, 16>}]} {
    %c0_i32 = arith.constant 0 : i32
    %0 = arith.cmpi eq, %arg1, %c0_i32 : i32
    %1 = arith.extui %0 : i1 to i32
    %c0_i32_0 = arith.constant 0 : i32
    %2 = arith.cmpi ne, %1, %c0_i32_0 : i32
    scf.if %2 {
      %cst_65 = arith.constant 0.000000e+00 : f32
      %117 = vector.broadcast %cst_65 : f32 to vector<16x16xf32>
      %c0_66 = arith.constant 0 : index
      %c0_67 = arith.constant 0 : index
      %c0_68 = arith.constant 0 : index
      %c0_69 = arith.constant 0 : index
      %118 = vector.load %arg5[%c0_66, %c0_67, %c0_68, %c0_69] : memref<1x2x16x16xf32, #tpu.memory_space<vmem>>, vector<1x1x16x16xf32>
      %119 = vector.shape_cast %118 : vector<1x1x16x16xf32> to vector<16x16xf32>
      %c0_70 = arith.constant 0 : index
      %c0_71 = arith.constant 0 : index
      %120 = vector.load %arg9[%c0_70, %c0_71] : memref<16x16xf32, #tpu.memory_space<vmem>>, vector<16x16xf32>
      tpu.vector_store %arg9[%c0_70, %c0_71], %119 {strides = array<i32>} : memref<16x16xf32, #tpu.memory_space<vmem>>, vector<16x16xf32>,
      %c0_72 = arith.constant 0 : index
      %c1 = arith.constant 1 : index
      %c0_73 = arith.constant 0 : index
      %c0_74 = arith.constant 0 : index
      %121 = vector.load %arg5[%c0_72, %c1, %c0_73, %c0_74] : memref<1x2x16x16xf32, #tpu.memory_space<vmem>>, vector<1x1x16x16xf32>
      %122 = vector.shape_cast %121 : vector<1x1x16x16xf32> to vector<16x16xf32>
      %c0_75 = arith.constant 0 : index
      %c0_76 = arith.constant 0 : index
      %123 = vector.load %arg10[%c0_75, %c0_76] : memref<16x16xf32, #tpu.memory_space<vmem>>, vector<16x16xf32>
      tpu.vector_store %arg10[%c0_75, %c0_76], %122 {strides = array<i32>} : memref<16x16xf32, #tpu.memory_space<vmem>>, vector<16x16xf32>,
      %c0_77 = arith.constant 0 : index
      %c0_78 = arith.constant 0 : index
      %124 = vector.load %arg11[%c0_77, %c0_78] : memref<16x16xf32, #tpu.memory_space<vmem>>, vector<16x16xf32>
      tpu.vector_store %arg11[%c0_77, %c0_78], %117 {strides = array<i32>} : memref<16x16xf32, #tpu.memory_space<vmem>>, vector<16x16xf32>,
      %c0_79 = arith.constant 0 : index
      %c0_80 = arith.constant 0 : index
      %125 = vector.load %arg12[%c0_79, %c0_80] : memref<16x16xf32, #tpu.memory_space<vmem>>, vector<16x16xf32>
      tpu.vector_store %arg12[%c0_79, %c0_80], %117 {strides = array<i32>} : memref<16x16xf32, #tpu.memory_space<vmem>>, vector<16x16xf32>,
      %c0_81 = arith.constant 0 : index
      %c0_82 = arith.constant 0 : index
      %126 = vector.load %arg13[%c0_81, %c0_82] : memref<16x16xf32, #tpu.memory_space<vmem>>, vector<16x16xf32>
      tpu.vector_store %arg13[%c0_81, %c0_82], %117 {strides = array<i32>} : memref<16x16xf32, #tpu.memory_space<vmem>>, vector<16x16xf32>,
      %c0_83 = arith.constant 0 : index
      %c0_84 = arith.constant 0 : index
      %127 = vector.load %arg14[%c0_83, %c0_84] : memref<16x16xf32, #tpu.memory_space<vmem>>, vector<16x16xf32>
      tpu.vector_store %arg14[%c0_83, %c0_84], %117 {strides = array<i32>} : memref<16x16xf32, #tpu.memory_space<vmem>>, vector<16x16xf32>,
    } else {
    }
    %c0 = arith.constant 0 : index
    %c0_1 = arith.constant 0 : index
    %c0_2 = arith.constant 0 : index
    %3 = vector.load %arg3[%c0, %c0_1, %c0_2] : memref<1x16x16xbf16, #tpu.memory_space<vmem>>, vector<1x16x16xbf16>
    %4 = vector.shape_cast %3 : vector<1x16x16xbf16> to vector<16x16xbf16>
    %5 = tpu.iota {dimensions = array<i32: 0>} : vector<16x16xi32>
    %6 = tpu.iota {dimensions = array<i32: 0>} : vector<16x16xi32>
    %7 = tpu.iota {dimensions = array<i32: 1>} : vector<1x16xi32>
    %c0_i32_3 = arith.constant 0 : i32
    %c16_i32 = arith.constant 16 : i32
    %8 = arith.addi %c0_i32_3, %c16_i32 : i32
    %c1_i32 = arith.constant 1 : i32
    scf.for %arg18 = %c0_i32_3 to %8 step %c1_i32  : i32 {
      %c1_i32_65 = arith.constant 1 : i32
      %117 = arith.muli %arg18, %c1_i32_65 : i32
      %c0_i32_66 = arith.constant 0 : i32
      %118 = arith.addi %c0_i32_66, %117 : i32
      %119 = arith.index_cast %118 : i32 to index
      %c0_67 = arith.constant 0 : index
      %120 = vector.load %arg9[%119, %c0_67] : memref<16x16xf32, #tpu.memory_space<vmem>>, vector<1x16xf32>
      %121 = arith.index_cast %118 : i32 to index
      %c0_68 = arith.constant 0 : index
      %122 = vector.load %arg10[%121, %c0_68] : memref<16x16xf32, #tpu.memory_space<vmem>>, vector<1x16xf32>
      %c0_i32_69 = arith.constant 0 : i32
      %123 = vector.broadcast %c0_i32_69 : i32 to vector<1x16xi32>
      %124 = arith.addi %7, %123 : vector<1x16xi32>
      %125 = arith.sitofp %124 : vector<1x16xi32> to vector<1x16xf32>
      %126 = arith.addf %125, %120 : vector<1x16xf32>
      %127 = arith.sitofp %118 : i32 to f32
      %128 = vector.broadcast %127 : f32 to vector<1x16xf32>
      %129 = arith.addf %128, %122 : vector<1x16xf32>
      %130 = math.floor %126 : vector<1x16xf32>
      %131 = math.floor %129 : vector<1x16xf32>
      %132 = arith.subf %126, %130 : vector<1x16xf32>
      %133 = arith.subf %129, %131 : vector<1x16xf32>
      %134 = arith.fptosi %130 : vector<1x16xf32> to vector<1x16xi32>
      %135 = arith.fptosi %131 : vector<1x16xf32> to vector<1x16xi32>
      %136 = vector.broadcast %135 : vector<1x16xi32> to vector<16x16xi32>
      %137 = arith.cmpi eq, %5, %136 : vector<16x16xi32>
      %138 = arith.extui %137 : vector<16x16xi1> to vector<16x16xi32>
      %139 = arith.sitofp %138 : vector<16x16xi32> to vector<16x16xf32>
      %140 = arith.truncf %139 : vector<16x16xf32> to vector<16x16xbf16>
      %c1_i32_70 = arith.constant 1 : i32
      %141 = vector.broadcast %c1_i32_70 : i32 to vector<1x16xi32>
      %142 = arith.addi %135, %141 : vector<1x16xi32>
      %143 = vector.broadcast %142 : vector<1x16xi32> to vector<16x16xi32>
      %144 = arith.cmpi eq, %5, %143 : vector<16x16xi32>
      %145 = arith.extui %144 : vector<16x16xi1> to vector<16x16xi32>
      %146 = arith.sitofp %145 : vector<16x16xi32> to vector<16x16xf32>
      %147 = arith.truncf %146 : vector<16x16xf32> to vector<16x16xbf16>
      %cst_71 = arith.constant dense<0.000000e+00> : vector<16x16xf32>
      %148 = tpu.matmul %4, %140, %cst_71 {dimension_numbers = #tpu.dot_dimension_numbers<[1], [0], [0], [1], [0, 0, 1, 1], [], []>} : vector<16x16xbf16>, vector<16x16xbf16>, vector<16x16xf32> -> vector<16x16xf32>
      %cst_72 = arith.constant dense<0.000000e+00> : vector<16x16xf32>
      %149 = tpu.matmul %4, %147, %cst_72 {dimension_numbers = #tpu.dot_dimension_numbers<[1], [0], [0], [1], [0, 0, 1, 1], [], []>} : vector<16x16xbf16>, vector<16x16xbf16>, vector<16x16xf32> -> vector<16x16xf32>
      %150 = arith.subf %149, %148 : vector<16x16xf32>
      %151 = vector.broadcast %133 : vector<1x16xf32> to vector<16x16xf32>
      %152 = arith.mulf %151, %150 : vector<16x16xf32>
      %153 = arith.addf %148, %152 : vector<16x16xf32>
      %154 = vector.broadcast %134 : vector<1x16xi32> to vector<16x16xi32>
      %155 = arith.cmpi eq, %6, %154 : vector<16x16xi32>
      %c1_i32_73 = arith.constant 1 : i32
      %156 = vector.broadcast %c1_i32_73 : i32 to vector<1x16xi32>
      %157 = arith.addi %134, %156 : vector<1x16xi32>
      %158 = vector.broadcast %157 : vector<1x16xi32> to vector<16x16xi32>
      %159 = arith.cmpi eq, %6, %158 : vector<16x16xi32>
      %cst_74 = arith.constant 0.000000e+00 : f32
      %160 = vector.broadcast %cst_74 : f32 to vector<16x16xf32>
      %161 = arith.select %155, %153, %160 : vector<16x16xi1>, vector<16x16xf32>
      %cst_75 = arith.constant dense<0.000000e+00> : vector<16xf32>
      %162 = vector.multi_reduction <add>, %161, %cst_75 [0] : vector<16x16xf32> to vector<16xf32>
      %163 = vector.shape_cast %162 : vector<16xf32> to vector<1x16xf32>
      %cst_76 = arith.constant 0.000000e+00 : f32
      %164 = vector.broadcast %cst_76 : f32 to vector<16x16xf32>
      %165 = arith.select %159, %153, %164 : vector<16x16xi1>, vector<16x16xf32>
      %cst_77 = arith.constant dense<0.000000e+00> : vector<16xf32>
      %166 = vector.multi_reduction <add>, %165, %cst_77 [0] : vector<16x16xf32> to vector<16xf32>
      %167 = vector.shape_cast %166 : vector<16xf32> to vector<1x16xf32>
      %cst_78 = arith.constant 0.000000e+00 : f32
      %168 = vector.broadcast %cst_78 : f32 to vector<16x16xf32>
      %169 = arith.select %155, %150, %168 : vector<16x16xi1>, vector<16x16xf32>
      %cst_79 = arith.constant dense<0.000000e+00> : vector<16xf32>
      %170 = vector.multi_reduction <add>, %169, %cst_79 [0] : vector<16x16xf32> to vector<16xf32>
      %171 = vector.shape_cast %170 : vector<16xf32> to vector<1x16xf32>
      %cst_80 = arith.constant 0.000000e+00 : f32
      %172 = vector.broadcast %cst_80 : f32 to vector<16x16xf32>
      %173 = arith.select %159, %150, %172 : vector<16x16xi1>, vector<16x16xf32>
      %cst_81 = arith.constant dense<0.000000e+00> : vector<16xf32>
      %174 = vector.multi_reduction <add>, %173, %cst_81 [0] : vector<16x16xf32> to vector<16xf32>
      %175 = vector.shape_cast %174 : vector<16xf32> to vector<1x16xf32>
      %176 = arith.subf %167, %163 : vector<1x16xf32>
      %177 = arith.mulf %132, %176 : vector<1x16xf32>
      %178 = arith.addf %163, %177 : vector<1x16xf32>
      %179 = arith.index_cast %118 : i32 to index
      %c0_82 = arith.constant 0 : index
      %180 = vector.load %arg15[%179, %c0_82] : memref<16x16xf32, #tpu.memory_space<vmem>>, vector<1x16xf32>
      tpu.vector_store %arg15[%179, %c0_82], %178 {strides = array<i32>} : memref<16x16xf32, #tpu.memory_space<vmem>>, vector<1x16xf32>,
      %181 = arith.subf %167, %163 : vector<1x16xf32>
      %182 = arith.index_cast %118 : i32 to index
      %c0_83 = arith.constant 0 : index
      %183 = vector.load %arg16[%182, %c0_83] : memref<16x16xf32, #tpu.memory_space<vmem>>, vector<1x16xf32>
      tpu.vector_store %arg16[%182, %c0_83], %181 {strides = array<i32>} : memref<16x16xf32, #tpu.memory_space<vmem>>, vector<1x16xf32>,
      %184 = arith.subf %175, %171 : vector<1x16xf32>
      %185 = arith.mulf %132, %184 : vector<1x16xf32>
      %186 = arith.addf %171, %185 : vector<1x16xf32>
      %187 = arith.index_cast %118 : i32 to index
      %c0_84 = arith.constant 0 : index
      %188 = vector.load %arg17[%187, %c0_84] : memref<16x16xf32, #tpu.memory_space<vmem>>, vector<1x16xf32>
      tpu.vector_store %arg17[%187, %c0_84], %186 {strides = array<i32>} : memref<16x16xf32, #tpu.memory_space<vmem>>, vector<1x16xf32>,
    }
    %c16_i32_4 = arith.constant 16 : i32
    %c0_5 = arith.constant 0 : index
    %c0_6 = arith.constant 0 : index
    %c0_7 = arith.constant 0 : index
    %9 = vector.load %arg4[%c0_5, %c0_6, %c0_7] : memref<1x16x16xf32, #tpu.memory_space<vmem>>, vector<1x16x16xf32>
    %10 = vector.shape_cast %9 : vector<1x16x16xf32> to vector<16x16xf32>
    %11 = tpu.iota {dimensions = array<i32: 0>} : vector<16x16xi32>
    %12 = tpu.iota {dimensions = array<i32: 1>} : vector<16x16xi32>
    %c2_i32 = arith.constant 2 : i32
    %13 = vector.broadcast %c2_i32 : i32 to vector<16x16xi32>
    %14 = arith.cmpi sge, %12, %13 : vector<16x16xi32>
    %c14_i32 = arith.constant 14 : i32
    %15 = vector.broadcast %c14_i32 : i32 to vector<16x16xi32>
    %16 = arith.cmpi slt, %12, %15 : vector<16x16xi32>
    %17 = arith.andi %14, %16 : vector<16x16xi1>
    %c2_i32_8 = arith.constant 2 : i32
    %18 = vector.broadcast %c2_i32_8 : i32 to vector<16x16xi32>
    %19 = arith.cmpi sge, %11, %18 : vector<16x16xi32>
    %20 = arith.andi %17, %19 : vector<16x16xi1>
    %c14_i32_9 = arith.constant 14 : i32
    %21 = vector.broadcast %c14_i32_9 : i32 to vector<16x16xi32>
    %22 = arith.cmpi slt, %11, %21 : vector<16x16xi32>
    %23 = arith.andi %20, %22 : vector<16x16xi1>
    %24 = arith.extui %23 : vector<16x16xi1> to vector<16x16xi32>
    %25 = arith.sitofp %24 : vector<16x16xi32> to vector<16x16xf32>
    %cst = arith.constant 0.013888889 : f32
    %26 = vector.broadcast %cst : f32 to vector<16x16xf32>
    %27 = arith.mulf %26, %25 : vector<16x16xf32>
    %c0_10 = arith.constant 0 : index
    %c0_11 = arith.constant 0 : index
    %28 = vector.load %arg15[%c0_10, %c0_11] : memref<16x16xf32, #tpu.memory_space<vmem>>, vector<16x16xf32>
    %29 = arith.subf %28, %10 : vector<16x16xf32>
    %30 = arith.mulf %27, %29 : vector<16x16xf32>
    %c0_12 = arith.constant 0 : index
    %c0_13 = arith.constant 0 : index
    %31 = vector.load %arg6[%c0_12, %c0_13] : memref<16x16xf32, #tpu.memory_space<vmem>>, vector<16x16xf32>
    %c0_14 = arith.constant 0 : index
    %c0_15 = arith.constant 0 : index
    %32 = vector.load %arg7[%c0_14, %c0_15] : memref<16x16xf32, #tpu.memory_space<vmem>>, vector<16x16xf32>
    %c2_i32_16 = arith.constant 2 : i32
    %33 = arith.muli %c2_i32_16, %arg1 : i32
    %34 = arith.index_cast %33 : i32 to index
    %35 = memref.load %arg2[%34] : memref<10xf32, #tpu.memory_space<smem>>
    %c2_i32_17 = arith.constant 2 : i32
    %36 = arith.muli %c2_i32_17, %arg1 : i32
    %c1_i32_18 = arith.constant 1 : i32
    %37 = arith.addi %36, %c1_i32_18 : i32
    %38 = arith.index_cast %37 : i32 to index
    %39 = memref.load %arg2[%38] : memref<10xf32, #tpu.memory_space<smem>>
    %c4_i32 = arith.constant 4 : i32
    %40 = arith.cmpi eq, %arg1, %c4_i32 : i32
    %c0_19 = arith.constant 0 : index
    %c0_20 = arith.constant 0 : index
    %41 = vector.load %arg16[%c0_19, %c0_20] : memref<16x16xf32, #tpu.memory_space<vmem>>, vector<16x16xf32>
    %c0_21 = arith.constant 0 : index
    %c0_22 = arith.constant 0 : index
    %42 = vector.load %arg9[%c0_21, %c0_22] : memref<16x16xf32, #tpu.memory_space<vmem>>, vector<16x16xf32>
    %cst_23 = arith.constant dense<0.000000e+00> : vector<16x16xf32>
    %43 = tpu.matmul %42, %32, %cst_23 {dimension_numbers = #tpu.dot_dimension_numbers<[1], [0], [0], [1], [0, 0, 1, 1], [], []>} : vector<16x16xf32>, vector<16x16xf32>, vector<16x16xf32> -> vector<16x16xf32>
    %cst_24 = arith.constant dense<0.000000e+00> : vector<16x16xf32>
    %44 = tpu.matmul %31, %42, %cst_24 {dimension_numbers = #tpu.dot_dimension_numbers<[1], [0], [0], [1], [0, 0, 1, 1], [], []>} : vector<16x16xf32>, vector<16x16xf32>, vector<16x16xf32> -> vector<16x16xf32>
    %45 = arith.addf %43, %44 : vector<16x16xf32>
    %46 = arith.mulf %30, %41 : vector<16x16xf32>
    %47 = arith.addf %46, %45 : vector<16x16xf32>
    %cst_25 = arith.constant 1.000000e-03 : f32
    %48 = vector.broadcast %cst_25 : f32 to vector<16x16xf32>
    %49 = arith.mulf %48, %42 : vector<16x16xf32>
    %50 = arith.addf %47, %49 : vector<16x16xf32>
    %c0_26 = arith.constant 0 : index
    %c0_27 = arith.constant 0 : index
    %51 = vector.load %arg11[%c0_26, %c0_27] : memref<16x16xf32, #tpu.memory_space<vmem>>, vector<16x16xf32>
    %cst_28 = arith.constant 0.899999976 : f32
    %52 = vector.broadcast %cst_28 : f32 to vector<16x16xf32>
    %53 = arith.mulf %52, %51 : vector<16x16xf32>
    %cst_29 = arith.constant 1.000000e-01 : f32
    %54 = vector.broadcast %cst_29 : f32 to vector<16x16xf32>
    %55 = arith.mulf %54, %50 : vector<16x16xf32>
    %56 = arith.addf %53, %55 : vector<16x16xf32>
    %c0_30 = arith.constant 0 : index
    %c0_31 = arith.constant 0 : index
    %57 = vector.load %arg13[%c0_30, %c0_31] : memref<16x16xf32, #tpu.memory_space<vmem>>, vector<16x16xf32>
    %cst_32 = arith.constant 9.990000e-01 : f32
    %58 = vector.broadcast %cst_32 : f32 to vector<16x16xf32>
    %59 = arith.mulf %58, %57 : vector<16x16xf32>
    %cst_33 = arith.constant 1.000000e-03 : f32
    %60 = vector.broadcast %cst_33 : f32 to vector<16x16xf32>
    %61 = arith.mulf %60, %50 : vector<16x16xf32>
    %62 = arith.mulf %61, %50 : vector<16x16xf32>
    %63 = arith.addf %59, %62 : vector<16x16xf32>
    %c0_34 = arith.constant 0 : index
    %c0_35 = arith.constant 0 : index
    %64 = vector.load %arg11[%c0_34, %c0_35] : memref<16x16xf32, #tpu.memory_space<vmem>>, vector<16x16xf32>
    tpu.vector_store %arg11[%c0_34, %c0_35], %56 {strides = array<i32>} : memref<16x16xf32, #tpu.memory_space<vmem>>, vector<16x16xf32>,
    %c0_36 = arith.constant 0 : index
    %c0_37 = arith.constant 0 : index
    %65 = vector.load %arg13[%c0_36, %c0_37] : memref<16x16xf32, #tpu.memory_space<vmem>>, vector<16x16xf32>
    tpu.vector_store %arg13[%c0_36, %c0_37], %63 {strides = array<i32>} : memref<16x16xf32, #tpu.memory_space<vmem>>, vector<16x16xf32>,
    %66 = vector.broadcast %35 : f32 to vector<16x16xf32>
    %67 = arith.mulf %56, %66 : vector<16x16xf32>
    %68 = math.sqrt %63 : vector<16x16xf32>
    %69 = vector.broadcast %39 : f32 to vector<16x16xf32>
    %70 = arith.mulf %68, %69 : vector<16x16xf32>
    %cst_38 = arith.constant 9.99999993E-9 : f32
    %71 = vector.broadcast %cst_38 : f32 to vector<16x16xf32>
    %72 = arith.addf %70, %71 : vector<16x16xf32>
    %73 = tpu.reciprocal %72 {approx = true} : vector<16x16xf32> -> vector<16x16xf32>
    %74 = arith.mulf %67, %73 : vector<16x16xf32>
    %75 = arith.subf %42, %74 : vector<16x16xf32>
    %c0_39 = arith.constant 0 : index
    %c0_40 = arith.constant 0 : index
    %76 = vector.load %arg9[%c0_39, %c0_40] : memref<16x16xf32, #tpu.memory_space<vmem>>, vector<16x16xf32>
    tpu.vector_store %arg9[%c0_39, %c0_40], %75 {strides = array<i32>} : memref<16x16xf32, #tpu.memory_space<vmem>>, vector<16x16xf32>,
    %77 = arith.extui %40 : i1 to i32
    %c0_i32_41 = arith.constant 0 : i32
    %78 = arith.cmpi ne, %77, %c0_i32_41 : i32
    scf.if %78 {
      %c0_65 = arith.constant 0 : index
      %c0_66 = arith.constant 0 : index
      %c0_67 = arith.constant 0 : index
      %c0_68 = arith.constant 0 : index
      %117 = vector.load %arg8[%c0_65, %c0_66, %c0_67, %c0_68] : memref<1x2x16x16xf32, #tpu.memory_space<vmem>>, vector<1x1x16x16xf32>
      %118 = vector.shape_cast %117 : vector<1x1x16x16xf32> to vector<16x16xf32>
      %119 = vector.shape_cast %75 : vector<16x16xf32> to vector<1x1x16x16xf32>
      tpu.vector_store %arg8[%c0_65, %c0_66, %c0_67, %c0_68], %119 {strides = array<i32>} : memref<1x2x16x16xf32, #tpu.memory_space<vmem>>, vector<1x1x16x16xf32>,
    } else {
    }
    %c0_42 = arith.constant 0 : index
    %c0_43 = arith.constant 0 : index
    %79 = vector.load %arg17[%c0_42, %c0_43] : memref<16x16xf32, #tpu.memory_space<vmem>>, vector<16x16xf32>
    %c0_44 = arith.constant 0 : index
    %c0_45 = arith.constant 0 : index
    %80 = vector.load %arg10[%c0_44, %c0_45] : memref<16x16xf32, #tpu.memory_space<vmem>>, vector<16x16xf32>
    %cst_46 = arith.constant dense<0.000000e+00> : vector<16x16xf32>
    %81 = tpu.matmul %80, %32, %cst_46 {dimension_numbers = #tpu.dot_dimension_numbers<[1], [0], [0], [1], [0, 0, 1, 1], [], []>} : vector<16x16xf32>, vector<16x16xf32>, vector<16x16xf32> -> vector<16x16xf32>
    %cst_47 = arith.constant dense<0.000000e+00> : vector<16x16xf32>
    %82 = tpu.matmul %31, %80, %cst_47 {dimension_numbers = #tpu.dot_dimension_numbers<[1], [0], [0], [1], [0, 0, 1, 1], [], []>} : vector<16x16xf32>, vector<16x16xf32>, vector<16x16xf32> -> vector<16x16xf32>
    %83 = arith.addf %81, %82 : vector<16x16xf32>
    %84 = arith.mulf %30, %79 : vector<16x16xf32>
    %85 = arith.addf %84, %83 : vector<16x16xf32>
    %cst_48 = arith.constant 1.000000e-03 : f32
    %86 = vector.broadcast %cst_48 : f32 to vector<16x16xf32>
    %87 = arith.mulf %86, %80 : vector<16x16xf32>
    %88 = arith.addf %85, %87 : vector<16x16xf32>
    %c0_49 = arith.constant 0 : index
    %c0_50 = arith.constant 0 : index
    %89 = vector.load %arg12[%c0_49, %c0_50] : memref<16x16xf32, #tpu.memory_space<vmem>>, vector<16x16xf32>
    %cst_51 = arith.constant 0.899999976 : f32
    %90 = vector.broadcast %cst_51 : f32 to vector<16x16xf32>
    %91 = arith.mulf %90, %89 : vector<16x16xf32>
    %cst_52 = arith.constant 1.000000e-01 : f32
    %92 = vector.broadcast %cst_52 : f32 to vector<16x16xf32>
    %93 = arith.mulf %92, %88 : vector<16x16xf32>
    %94 = arith.addf %91, %93 : vector<16x16xf32>
    %c0_53 = arith.constant 0 : index
    %c0_54 = arith.constant 0 : index
    %95 = vector.load %arg14[%c0_53, %c0_54] : memref<16x16xf32, #tpu.memory_space<vmem>>, vector<16x16xf32>
    %cst_55 = arith.constant 9.990000e-01 : f32
    %96 = vector.broadcast %cst_55 : f32 to vector<16x16xf32>
    %97 = arith.mulf %96, %95 : vector<16x16xf32>
    %cst_56 = arith.constant 1.000000e-03 : f32
    %98 = vector.broadcast %cst_56 : f32 to vector<16x16xf32>
    %99 = arith.mulf %98, %88 : vector<16x16xf32>
    %100 = arith.mulf %99, %88 : vector<16x16xf32>
    %101 = arith.addf %97, %100 : vector<16x16xf32>
    %c0_57 = arith.constant 0 : index
    %c0_58 = arith.constant 0 : index
    %102 = vector.load %arg12[%c0_57, %c0_58] : memref<16x16xf32, #tpu.memory_space<vmem>>, vector<16x16xf32>
    tpu.vector_store %arg12[%c0_57, %c0_58], %94 {strides = array<i32>} : memref<16x16xf32, #tpu.memory_space<vmem>>, vector<16x16xf32>,
    %c0_59 = arith.constant 0 : index
    %c0_60 = arith.constant 0 : index
    %103 = vector.load %arg14[%c0_59, %c0_60] : memref<16x16xf32, #tpu.memory_space<vmem>>, vector<16x16xf32>
    tpu.vector_store %arg14[%c0_59, %c0_60], %101 {strides = array<i32>} : memref<16x16xf32, #tpu.memory_space<vmem>>, vector<16x16xf32>,
    %104 = vector.broadcast %35 : f32 to vector<16x16xf32>
    %105 = arith.mulf %94, %104 : vector<16x16xf32>
    %106 = math.sqrt %101 : vector<16x16xf32>
    %107 = vector.broadcast %39 : f32 to vector<16x16xf32>
    %108 = arith.mulf %106, %107 : vector<16x16xf32>
    %cst_61 = arith.constant 9.99999993E-9 : f32
    %109 = vector.broadcast %cst_61 : f32 to vector<16x16xf32>
    %110 = arith.addf %108, %109 : vector<16x16xf32>
    %111 = tpu.reciprocal %110 {approx = true} : vector<16x16xf32> -> vector<16x16xf32>
    %112 = arith.mulf %105, %111 : vector<16x16xf32>
    %113 = arith.subf %80, %112 : vector<16x16xf32>
    %c0_62 = arith.constant 0 : index
    %c0_63 = arith.constant 0 : index
    %114 = vector.load %arg10[%c0_62, %c0_63] : memref<16x16xf32, #tpu.memory_space<vmem>>, vector<16x16xf32>
    tpu.vector_store %arg10[%c0_62, %c0_63], %113 {strides = array<i32>} : memref<16x16xf32, #tpu.memory_space<vmem>>, vector<16x16xf32>,
    %115 = arith.extui %40 : i1 to i32
    %c0_i32_64 = arith.constant 0 : i32
    %116 = arith.cmpi ne, %115, %c0_i32_64 : i32
    scf.if %116 {
      %c0_65 = arith.constant 0 : index
      %c1 = arith.constant 1 : index
      %c0_66 = arith.constant 0 : index
      %c0_67 = arith.constant 0 : index
      %117 = vector.load %arg8[%c0_65, %c1, %c0_66, %c0_67] : memref<1x2x16x16xf32, #tpu.memory_space<vmem>>, vector<1x1x16x16xf32>
      %118 = vector.shape_cast %117 : vector<1x1x16x16xf32> to vector<16x16xf32>
      %119 = vector.shape_cast %113 : vector<16x16xf32> to vector<1x1x16x16xf32>
      tpu.vector_store %arg8[%c0_65, %c1, %c0_66, %c0_67], %119 {strides = array<i32>} : memref<1x2x16x16xf32, #tpu.memory_space<vmem>>, vector<1x1x16x16xf32>,
    } else {
    }
    return
  }
  func.func @transform_0(%arg0: i32, %arg1: i32, %arg2: memref<10xf32, #tpu.memory_space<smem>>) -> (i32, i32, i32) {
    %c0_i32 = arith.constant 0 : i32
    %c0_i32_0 = arith.constant 0 : i32
    %c0_i32_1 = arith.constant 0 : i32
    return %arg0, %c0_i32, %c0_i32_0 : i32, i32, i32
  }
  func.func @transform_1(%arg0: i32, %arg1: i32, %arg2: memref<10xf32, #tpu.memory_space<smem>>) -> (i32, i32, i32) {
    %c0_i32 = arith.constant 0 : i32
    %c0_i32_0 = arith.constant 0 : i32
    %c0_i32_1 = arith.constant 0 : i32
    return %arg0, %c0_i32, %c0_i32_0 : i32, i32, i32
  }
  func.func @transform_2(%arg0: i32, %arg1: i32, %arg2: memref<10xf32, #tpu.memory_space<smem>>) -> (i32, i32, i32, i32) {
    %c0_i32 = arith.constant 0 : i32
    %c0_i32_0 = arith.constant 0 : i32
    %c0_i32_1 = arith.constant 0 : i32
    %c0_i32_2 = arith.constant 0 : i32
    return %arg0, %c0_i32, %c0_i32_0, %c0_i32_1 : i32, i32, i32, i32
  }
  func.func @transform_3(%arg0: i32, %arg1: i32, %arg2: memref<10xf32, #tpu.memory_space<smem>>) -> (i32, i32) {
    %c0_i32 = arith.constant 0 : i32
    %c0_i32_0 = arith.constant 0 : i32
    %c0_i32_1 = arith.constant 0 : i32
    return %c0_i32, %c0_i32_0 : i32, i32
  }
  func.func @transform_4(%arg0: i32, %arg1: i32, %arg2: memref<10xf32, #tpu.memory_space<smem>>) -> (i32, i32) {
    %c0_i32 = arith.constant 0 : i32
    %c0_i32_0 = arith.constant 0 : i32
    %c0_i32_1 = arith.constant 0 : i32
    return %c0_i32, %c0_i32_0 : i32, i32
  }
  func.func @transform_5(%arg0: i32, %arg1: i32, %arg2: memref<10xf32, #tpu.memory_space<smem>>) -> (i32, i32, i32, i32) {
    %c0_i32 = arith.constant 0 : i32
    %c0_i32_0 = arith.constant 0 : i32
    %c0_i32_1 = arith.constant 0 : i32
    %c0_i32_2 = arith.constant 0 : i32
    return %arg0, %c0_i32, %c0_i32_0, %c0_i32_1 : i32, i32, i32, i32
  }
}

</mosaic_0001>

<bundles_post_ra>
// kernel: finetune_pallas.1
= control target key start
LH: loop header
LB: loop body
LE: loop exit
PB: predicated region body
PF: predicated region fallthrough
CT: control target
= control target key end

     0   :  { %s1162_s24 = smov [#allocation12]   ;;  %s1541_s0 = inlined_call_operand.vmem [shape: f32[10], index: 0, kind: input, shape index: {}]   ;;  %s1542_s1 = inlined_call_operand.vmem [shape: bf16[2,16,16], index: 1, kind: input, shape index: {}]   ;;  %s1543_s2 = inlined_call_operand.vmem [shape: f32[2,16,16], index: 2, kind: input, shape index: {}]   ;;  %s1544_s3 = inlined_call_operand.vmem [shape: f32[2,2,16,16], index: 3, kind: input, shape index: {}]   ;;  %s1545_s4 = inlined_call_operand.vmem [shape: f32[16,16], index: 4, kind: input, shape index: {}, may-alias: {4,5}]   ;;  %s1546_s5 = inlined_call_operand.vmem [shape: f32[16,16], index: 5, kind: input, shape index: {}, may-alias: {4,5}]   ;;  %s1547_s6 = inlined_call_operand.hbm [shape: f32[2,2,16,16], index: 6, kind: output, shape index: {}]  }
   0x1   :  { %s12_s23 = sshll.u32 %s1541_s0, 4  ;;  %s13_s23 = int_to_ptr.vmem [resolvable:$true] %s12_s23 }
   0x2   :  { %15 = dma.vmem_to_smem %s13_s23, 16, %s1162_s24, [#allocation11] }
   0x3   :  { %1120 = dma.done.wait [#allocation11], 16 }
   0x4   :  { %1121 = vsyncadd [#allocation11], 4294967280 }
   0x5   :  { %18 = sfence }
   0x6   :  { %19 = vsyncpa [#allocation14], 0 }
   0x7   :  { %21 = vsyncpa [#allocation14 + $0x1], 0  ;;  %s1206_s25 = smov 0   ;;  %s1208_s26 = smov 0  }
   0x8   :  { %s1210_s27 = smov 0   ;;  %s1212_s28 = smov 0  }
   0x9   :  { %s1214_s29 = smov 0   ;;  %s1216_s30 = smov 0  }
   0xa   :  { %s1218_s0 = smov 0   ;;  %s1220_s7 = smov 0  }
   0xb LB: > { %1551 = sst [smem:[#allocation17_spill]] %s1148_s30  ;;  %s885_s8 = sadd.s32 4294967295, %s1156_s7   ;;  %s1156_s7 = sphi %s1220_s7, %s27_s7   ;;  %s1152_s0 = sphi %s1218_s0, %s1568_s0   ;;  %s1148_s30 = sphi %s1216_s30, %s1567_s30   ;;  %s1144_s29 = sphi %s1214_s29, %s1566_s29   ;;  %s1140_s28 = sphi %s1212_s28, %s1565_s28   ;;  %s1136_s27 = sphi %s1210_s27, %s1571_s27   ;;  %s1132_s26 = sphi %s1208_s26, %s1570_s26   ;;  %s1128_s25 = sphi %s1206_s25, %s1569_s25  }
   0xc   : > { %1552 = sst [smem:[#allocation18_spill]] %s1152_s0  ;;  %s886_s9 = sadd.s32 4294967294, %s1156_s7  }
   0xd   : > { %s36_s10 = sadd.s32 1, %s1148_s30  ;;  %s39_s11 = sadd.s32 1, %s1152_s0 }
   0xe   : > { %p37_p0 = scmp.ge.s32.totalorder %s36_s10, 5  ;;  %p176_p1 = scmp.ne.s32.totalorder %s1136_s27, %s1132_s26 }
   0xf   : > { %p177_p2 = scmp.eq.s32.totalorder %s885_s8, 9  ;;  %p182_p4 = scmp.ne.s32.totalorder %s1132_s26, %s1128_s25 }
  0x10   : > { %s1573_s10 = smov (%p37_p0, %s36_s10), 0  ;;  %s1575_s11 = smov (!%p37_p0, %s39_s11), %s1152_s0 }
  0x11   : > { %1553 = sst [smem:[#allocation19_spill]] %s1573_s10  ;;  %p1255_p3 = por %p177_p2, %p176_p1 }
  0x12   : > { %p41_p5 = scmp.ge.s32.totalorder %s1575_s11, 2  ;;  %p183_p6 = scmp.eq.s32.totalorder %s886_s9, 9 }
  0x13   : > { %p889_p7 = scmp.ge.s32.totalorder %s1156_s7, 1  ;;  %p231_p8 = scmp.lt.s32.totalorder %s1156_s7, 11 }
  0x14   : > { %s1577_s11 = smov (%p41_p5, %s1575_s11), 0  ;;  %p1265_p9 = por %p183_p6, %p182_p4 }
  0x15   : > { %1555 = sst [smem:[#allocation20_spill]] %s1577_s11  ;;  %p232_p10 = pnand %p889_p7, %p231_p8 }
  0x16   : > { %s163_s14 = ssub.s32 %s1152_s0, %s1577_s11  ;;  %s166_s15 = sadd.s32 1, %s1136_s27 }
  0x17   : > { %p164_p11 = scmp.eq.s32.totalorder %s163_s14, 0  ;;  %235 = sbr.rel (%p232_p10) target bundleno = 606 (0x25e), region = 40 }
  0x18   : > { %s266_s17 = sand.u32 (!%p232_p10), 1, %s1132_s26   ;;  %p269_p12 = scmp.lt.s32.totalorder (!%p232_p10), %s1144_s29, 1 }
  0x19   : > { %s1273_s16 = scalar_select %p164_p11, %s1136_s27, %s166_s15  }
  0x1a   : > { %s890_s18 = sshll.u32 (!%p232_p10), %s266_s17, 5  ;;  %p897_p13 = scmp.ne.s32.totalorder (!%p232_p10), %s1140_s28, 0 }
  0x1b   : > { %s1291_s30 = scalar_lea.vmem (!%p232_p10), [#allocation13], %s890_s18 }
  0x1c   : > { %s270_s19 = scalar_select %p269_p12, %s1144_s29, 1 }
  0x1d   : > { %288 = sbr.rel (%p897_p13) target bundleno = 47 (0x2f), region = 44 }
  0x1e   : > { %s934_s20 = sshll.u32 %s270_s19, 3  ;;  %s935_s21 = sshll.u32 %s270_s19, 4 }
  0x1f   : > { %s273_s24 = scalar_lea.vmem %s1542_s1, %s934_s20  ;;  %s1286_s14 = scalar_lea.vmem %s1543_s2, %s935_s21 }
  0x20   : > { %s936_s15 = sshll.u32 %s270_s19, 5 }
  0x21   : > { %s283_s0 = scalar_lea.vmem %s1544_s3, %s936_s15 }
  0x22   : > { %v289_v0 = vld [vmem:[%s283_s0] sm:$0xff]  ;;  %vm291_vm0 = vcmask 130048   ;;  %v290_v1 = vld [vmem:[%s283_s0 + $0x8] sm:$0xff]  ;;  %v898_v2 = vld [vmem:[%s283_s0 + $0x10] sm:$0xff]  ;;  %v1163_v4 = vmov 0.0  }
  0x23   : > { %292 = vst.msk [vmem:[#allocation2] sm:$0xff] %vm291_vm0, %v289_v0  ;;  %v899_v3 = vld [vmem:[%s283_s0 + $0x18] sm:$0xff] }
  0x24   : > { %293 = vst.msk [vmem:[#allocation2 + $0x8] sm:$0xff] %vm291_vm0, %v290_v1 }
  0x25   : > { %297 = vst.msk [vmem:[#allocation3] sm:$0xff] %vm291_vm0, %v898_v2 }
  0x26   : > { %298 = vst.msk [vmem:[#allocation3 + $0x8] sm:$0xff] %vm291_vm0, %v899_v3 }
  0x27   : > { %299 = vst.msk [vmem:[#allocation4] sm:$0xff] %vm291_vm0, %v1163_v4 }
  0x28   : > { %300 = vst.msk [vmem:[#allocation4 + $0x8] sm:$0xff] %vm291_vm0, %v1163_v4 }
  0x29   : > { %301 = vst.msk [vmem:[#allocation5] sm:$0xff] %vm291_vm0, %v1163_v4 }
  0x2a   : > { %302 = vst.msk [vmem:[#allocation5 + $0x8] sm:$0xff] %vm291_vm0, %v1163_v4 }
  0x2b   : > { %303 = vst.msk [vmem:[#allocation6] sm:$0xff] %vm291_vm0, %v1163_v4 }
  0x2c   : > { %304 = vst.msk [vmem:[#allocation6 + $0x8] sm:$0xff] %vm291_vm0, %v1163_v4 }
  0x2d   : > { %305 = vst.msk [vmem:[#allocation7] sm:$0xff] %vm291_vm0, %v1163_v4 }
  0x2e   : > { %306 = vst.msk [vmem:[#allocation7 + $0x8] sm:$0xff] %vm291_vm0, %v1163_v4 }
  0x2f PF: > { %v1306_v5 = vld [vmem:[%s273_s24] sm:$0xf]  ;;  %v1308_v6 = vld [vmem:[%s273_s24] sm:$0xf0]  ;;  %v309_v7 = vlaneseq  ;;  %s1317_s0 = smov 0  }
  0x31   : > { %v1310_v8 = vshrl.u32 %v309_v7, 7  ;;  %v1312_v9 = vand.u32 127, %v309_v7 }
  0x33   : > { %v1315_v10 = vadd.s32 8, %v1310_v8 }
  0x34 LB: >> { %s326_s10 = scvt.s32.f32 %s1160_s0  ;;  %s322_s11 = scalar_lea.vmem [#allocation3], %s1160_s0  ;;  %v907_v19 = vor.u32 %v1308_v6, %v1306_v5  ;;  %v1164_v20 = vmov 1.0|1.0   ;;  %vm357_vm6 = vcmask 130048   ;;  %v324_v21 = vcvt.s32.f32 %v1312_v9  ;;  %s1160_s0 = sphi %s1317_s0, %s319_s0  }
  0x35   : >> { %v323_v11 = vld [vmem:[%s322_s11] sm:$0x1]  ;;  %s320_s18 = scalar_lea.vmem [#allocation2], %s1160_s0  ;;  %vm451_vm12 = vcmask 122880   ;;  %s453_s19 = scalar_lea.vmem [#allocation9], %s1160_s0 }
  0x36   : >> { %v327_v12 = vstv %s326_s10  ;;  %v321_v22 = vld [vmem:[%s320_s18] sm:$0x1]  ;;  %s458_s20 = scalar_lea.vmem [#allocation10], %s1160_s0  ;;  %s450_s21 = scalar_lea.vmem [#allocation8], %s1160_s0 }
  0x37   : >> { %v328_v13 = vadd.f32 %v327_v12, %v323_v11  ;;  %v325_v23 = vadd.f32 %v324_v21, %v321_v22  ;;  %s319_s0 = sadd.s32 1, %s1160_s0  }
  0x38   : >> { %p316_p0 = scmp.ge.s32.totalorder %s319_s0, 16  }
  0x39   : >> { %v330_v14 = vfloor.f32 %v328_v13  ;;  %v329_v24 = vfloor.f32 %v325_v23  ;;  %v1403_v5 = vld [vmem:[%s1545_s4] sm:$0xff] (%p316_p0)  ;;  %v1414_v6 = vld [vmem:[%s1545_s4 + $0x8] sm:$0xff] (%p316_p0)  ;;  %vm462_vm13 = vcmp.ge.s32.totalorder (%p316_p0), %v1312_v9, 2  ;;  %vm463_vm14 = vcmp.lt.s32.totalorder (%p316_p0), %v1312_v9, 14  ;;  %p921_p1 = scmp.ne.s32.totalorder (%p316_p0), %s1140_s28, 4 }
  0x3a   : > { %vm464_vm15 = vmand (%p316_p0), %vm462_vm13, %vm463_vm14  ;;  %vm465_vm0 = vcmp.ge.s32.totalorder (%p316_p0), %v1310_v8, 2  ;;  %v460_v41 = vld [vmem:[%s1286_s14] sm:$0xff] (%p316_p0)  ;;  %v1165_v42 = vmov (%p316_p0), 0.0  }
  0x3b   : >> { %v942_v15 = vcvt.f32.s32 %v330_v14  ;;  %v940_v25 = vcvt.f32.s32 %v329_v24  ;;  %v332_v26 = vsub.f32 %v328_v13, %v330_v14  ;;  %v331_v22 = vsub.f32 %v325_v23, %v329_v24  ;;  %v1384_v24 = vld [vmem:[#allocation2 + $0x8] sm:$0xff] (%p316_p0) }
  0x3d   : >> { %v335_v16 = vperm.slane %v942_v15, 0  ;;  %v343_v17 = vadd.s32 1, %v942_v15  ;;  %v399_v28 = vadd.s32 1, %v940_v25  ;;  %v391_v30 = vperm.slane %v332_v26, 0 }
  0x3e   : >> { %v396_v32 = vperm.slane %v940_v25, 0 }
  0x3f   : >> { %vm336_vm1 = vcmp.eq.s32.totalorder %v1310_v8, %v335_v16  ;;  %vm337_vm2 = vcmp.eq.s32.totalorder %v1315_v10, %v335_v16  ;;  %v344_v18 = vperm.slane %v343_v17, 0  ;;  %v400_v33 = vperm.slane %v399_v28, 0 }
  0x40   : >> { %vm908_vm3 = vmpackc.low %vm337_vm2, %vm336_vm1  ;;  %vm1335_vm8 = vcmp.eq.s32.totalorder %v1310_v8, %v396_v32  ;;  %vm1347_vm10 = vcmp.eq.s32.totalorder %v1315_v10, %v396_v32  ;;  %vm470_vm2 = vcmp.lt.s32.totalorder (%p316_p0), %v1315_v10, 14 }
  0x41   : >> { %909 = vmatpush.bf16.msk.msra.mxu0 %vm908_vm3, %v1164_v20  ;;  %vm345_vm4 = vcmp.eq.s32.totalorder %v1310_v8, %v344_v18  ;;  %vm346_vm5 = vcmp.eq.s32.totalorder %v1315_v10, %v344_v18  ;;  %vm1340_vm9 = vcmp.eq.s32.totalorder %v1310_v8, %v400_v33  ;;  %vm1352_vm11 = vcmp.eq.s32.totalorder %v1315_v10, %v400_v33  ;;  %vm467_vm1 = vmand (%p316_p0), %vm464_vm15, %vm465_vm0 }
  0x42   : >> { %vm911_vm7 = vmpackc.low %vm346_vm5, %vm345_vm4 }
  0x43   : >> { %912 = vmatpush.bf16.msk.msra.mxu1 %vm911_vm7, %v1164_v20  ;;  %vm472_vm3 = vmand (%p316_p0), %vm464_vm15, %vm470_vm2 }
  0x44   : >> { %910 = vmatmul.msk.bf16.vlgmr.msra.gmra.mxu0 %vm357_vm6, %v907_v19 }
  0x45   : > { %519 = vmatpush.msra.mxu0 (%p316_p0), %v1384_v24 }
  0x46   : >> { %913 = vmatmul.msk.bf16.vlgmr.msra.gmra.mxu1 %vm357_vm6, %v907_v19 }
  0xc1   : >> { %v370_v27 = vpop.f32.mrf.mxu0 }
  0xc3   : >> { %v384_v29 = vpop.f32.mrf.mxu1 }
  0xc4   : >> { %v389_v31 = vsub.f32 %v384_v29, %v370_v27 }
  0xc6   : >> { %v392_v34 = vmul.f32 %v391_v30, %v389_v31  ;;  %v425_v38 = vsel %vm1335_vm8, %v389_v31, 0.0  ;;  %v436_v43 = vsel %vm1340_vm9, %v389_v31, 0.0 }
  0xc7   : >> { %v427_v45 = vsel %vm357_vm6, %v425_v38, 0.0  ;;  %v438_v50 = vsel %vm357_vm6, %v436_v43, 0.0  ;;  %v1389_v38 = vld [vmem:[%s1546_s5 + $0x8] sm:$0xff] (%p316_p0)  ;;  %v914_v43 = vsel (%p316_p0), %vm467_vm1, 1.0, %v1165_v42 }
  0xc8   : >> { %v394_v37 = vadd.f32 %v392_v34, %v370_v27  ;;  %548 = vmatpush.msra.mxu1 (%p316_p0), %v1389_v38 }
  0xc9   : >> { %v372_v39 = vpop.f32.mrf.mxu0 }
  0xca   : >> { %v403_v49 = vsel %vm1335_vm8, %v394_v37, 0.0  ;;  %v414_v53 = vsel %vm1340_vm9, %v394_v37, 0.0 }
  0xcb   : >> { %v386_v40 = vpop.f32.mrf.mxu1  ;;  %v405_v61 = vsel %vm357_vm6, %v403_v49, 0.0  ;;  %v416_v62 = vsel %vm357_vm6, %v414_v53, 0.0  ;;  %v461_v49 = vld [vmem:[%s1286_s14 + $0x8] sm:$0xff] (%p316_p0)  ;;  %s916_s14 = sshll.u32 (%p316_p0), %s1140_s28, 1 }
  0xcc   : >> { %v390_v44 = vsub.f32 %v386_v40, %v372_v39  ;;  %v1398_v40 = vld [vmem:[%s1546_s5] sm:$0xff] (%p316_p0)  ;;  %s491_s11 = sadd.s32 (%p316_p0), 1, %s916_s14 }
  0xcd   : > { %549 = vmatpush.msra.mxu1 (%p316_p0), %v1398_v40  ;;  %s492_s18 = sld [smem:[#allocation12 + %s491_s11]] (%p316_p0) }
  0xce   : >> { %v393_v46 = vmul.f32 %v391_v30, %v390_v44  ;;  %v426_v47 = vsel %vm1347_vm10, %v390_v44, 0.0  ;;  %v437_v48 = vsel %vm1352_vm11, %v390_v44, 0.0 }
  0xcf   : >> { %v428_v51 = vsel %vm357_vm6, %v426_v47, 0.0  ;;  %v439_v52 = vsel %vm357_vm6, %v437_v48, 0.0 }
  0xd0   : >> { %v395_v54 = vadd.f32 %v393_v46, %v372_v39  ;;  %v429_v55 = vadd.f32 %v428_v51, %v427_v45  ;;  %v440_v56 = vadd.f32 %v439_v52, %v438_v50  ;;  %v1391_v39 = vld [vmem:[#allocation2] sm:$0xff] (%p316_p0)  ;;  %v477_v45 = vmul.f32 (%p316_p0), 0.013888889, %v914_v43 }
  0xd1   : > { %520 = vmatpush.msra.mxu0 (%p316_p0), %v1391_v39  ;;  %919 = vmatmul.msk.f32.vlgmr.msra.gmra.mxu1 (%p316_p0), %vm357_vm6, %v1391_v39  ;;  %v915_v50 = vsel (%p316_p0), %vm472_vm3, 1.0, %v1165_v42 }
  0xd2   : >> { %v404_v57 = vsel %vm1347_vm10, %v395_v54, 0.0  ;;  %v415_v58 = vsel %vm1352_vm11, %v395_v54, 0.0  ;;  %v430_v59 = vrot.slane %v429_v55, 4  ;;  %v441_v60 = vrot.slane %v440_v56, 4  ;;  %917 = vmatmul.msk.f32.vlgmr.msra.gmra.mxu0 (%p316_p0), %vm357_vm6, %v1403_v5 }
  0xd3   : >> { %v406_v63 = vsel %vm357_vm6, %v404_v57, 0.0  ;;  %v417_v0 = vsel %vm357_vm6, %v415_v58, 0.0  ;;  %v478_v52 = vmul.f32 (%p316_p0), 0.013888889, %v915_v50  ;;  %v565_v57 = vld [vmem:[#allocation4] sm:$0xff] (%p316_p0) }
  0xd4   : >> { %v407_v1 = vadd.f32 %v406_v63, %v405_v61  ;;  %v418_v2 = vadd.f32 %v417_v0, %v416_v62  ;;  %v431_v3 = vadd.f32 %v430_v59, %v429_v55  ;;  %v442_v4 = vadd.f32 %v441_v60, %v440_v56  ;;  %v573_v59 = vld [vmem:[#allocation6] sm:$0xff] (%p316_p0) }
  0xd5   : > { %v561_v56 = vmul.f32 (%p316_p0), 0.001, %v1391_v39  ;;  %v567_v62 = vmul.f32 (%p316_p0), 0.9, %v565_v57  ;;  %v575_v0 = vmul.f32 (%p316_p0), 0.999, %v573_v59 }
  0xd6   : >> { %v408_v7 = vrot.slane %v407_v1, 4  ;;  %v419_v11 = vrot.slane %v418_v2, 4  ;;  %v432_v12 = vrot.slane %v431_v3, 2  ;;  %v443_v13 = vrot.slane %v442_v4, 2 }
  0xd8   : >> { %v409_v14 = vadd.f32 %v408_v7, %v407_v1  ;;  %v420_v15 = vadd.f32 %v419_v11, %v418_v2  ;;  %v433_v16 = vadd.f32 %v432_v12, %v431_v3  ;;  %v444_v17 = vadd.f32 %v443_v13, %v442_v4 }
  0xd9   : > { %920 = vmatmul.msk.f32.gmra.mxu1 (%p316_p0), %vm357_vm6, %v1384_v24  ;;  %v562_v13 = vmul.f32 (%p316_p0), 0.001, %v1384_v24 }
  0xda   : >> { %v410_v18 = vrot.slane %v409_v14, 2  ;;  %v421_v19 = vrot.slane %v420_v15, 2  ;;  %v434_v20 = vrot.slane %v433_v16, 1  ;;  %v445_v21 = vrot.slane %v444_v17, 1  ;;  %918 = vmatmul.msk.f32.gmra.mxu0 (%p316_p0), %vm357_vm6, %v1414_v6 }
  0xdc   : >> { %v411_v25 = vadd.f32 %v410_v18, %v409_v14  ;;  %v422_v26 = vadd.f32 %v421_v19, %v420_v15  ;;  %v435_v27 = vadd.f32 %v434_v20, %v433_v16  ;;  %v446_v28 = vadd.f32 %v445_v21, %v444_v17  ;;  %v566_v16 = vld [vmem:[#allocation4 + $0x8] sm:$0xff] (%p316_p0) }
  0xdd   : > { %v574_v17 = vld [vmem:[#allocation6 + $0x8] sm:$0xff] (%p316_p0)  ;;  %v568_v19 = vmul.f32 (%p316_p0), 0.9, %v566_v16 }
  0xde   : >> { %v412_v29 = vrot.slane %v411_v25, 1  ;;  %v423_v30 = vrot.slane %v422_v26, 1  ;;  %v455_v31 = vsub.f32 %v446_v28, %v435_v27  ;;  %v576_v21 = vmul.f32 (%p316_p0), 0.999, %v574_v17 }
  0xe0   : >> { %v413_v32 = vadd.f32 %v412_v29, %v411_v25  ;;  %v424_v33 = vadd.f32 %v423_v30, %v422_v26  ;;  %v456_v34 = vmul.f32 %v455_v31, %v331_v22 }
  0xe2   : >> { %v447_v35 = vsub.f32 %v424_v33, %v413_v32  ;;  %v457_v36 = vadd.f32 %v456_v34, %v435_v27 }
  0xe4   : >> { %v448_v37 = vmul.f32 %v447_v35, %v331_v22  ;;  %454 = vst.msk [vmem:[%s453_s19] sm:$0x1] %vm451_vm12, %v447_v35  ;;  %318 = sbr.rel (!%p316_p0) target bundleno = 52 (0x34), region = 107  ;;  %s490_s19 = sld [smem:[#allocation12 + %s916_s14]] (%p316_p0) }
  0xe5   : >> { %459 = vst.msk [vmem:[%s458_s20] sm:$0x1] %vm451_vm12, %v457_v36 }
  0xe6   : >> { %v449_v23 = vadd.f32 %v448_v37, %v413_v32 }
  0xe8   : >> { %452 = vst.msk [vmem:[%s450_s21] sm:$0x1] %vm451_vm12, %v449_v23  ;;  %v1439_v23 = vstv (%p316_p0), %s492_s18 }
  0xeb   : > { %v494_v48 = vld [vmem:[#allocation9] sm:$0xff]  ;;  %v495_v60 = vld [vmem:[#allocation9 + $0x8] sm:$0xff] }
  0xef   : > { %v479_v44 = vld [vmem:[#allocation8] sm:$0xff]  ;;  %v480_v51 = vld [vmem:[#allocation8 + $0x8] sm:$0xff] }
  0xf0   : > { %v481_v46 = vsub.f32 %v479_v44, %v460_v41  ;;  %v482_v8 = vsub.f32 %v480_v51, %v461_v49  ;;  %v1442_v51 = vstv %s490_s19 }
  0xf2   : > { %v1425_v47 = vmul.f32 %v481_v46, %v477_v45  ;;  %v1430_v58 = vmul.f32 %v482_v8, %v478_v52 }
  0xf4   : > { %v557_v9 = vmul.f32 %v494_v48, %v1425_v47  ;;  %v558_v2 = vmul.f32 %v495_v60, %v1430_v58 }
 0x14e   : > { %v551_v54 = vpop.f32.mrf.mxu1 }
 0x14f   : > { %v522_v53 = vpop.f32.mrf.mxu0 }
 0x150   : > { %v552_v55 = vadd.f32 %v551_v54, %v522_v53 }
 0x152   : > { %v559_v10 = vadd.f32 %v557_v9, %v552_v55 }
 0x154   : > { %v563_v61 = vadd.f32 %v561_v56, %v559_v10 }
 0x156   : > { %v569_v63 = vmul.f32 0.1, %v563_v61  ;;  %v577_v1 = vmul.f32 0.001, %v563_v61  ;;  %v554_v4 = vpop.f32.mrf.mxu1 }
 0x157   : > { %v525_v3 = vpop.f32.mrf.mxu0 }
 0x158   : > { %v571_v7 = vadd.f32 %v569_v63, %v567_v62  ;;  %v579_v11 = vmul.f32 %v577_v1, %v563_v61  ;;  %v555_v12 = vadd.f32 %v554_v4, %v525_v3 }
 0x15a   : > { %v581_v14 = vadd.f32 %v579_v11, %v575_v0  ;;  %583 = vst.msk [vmem:[#allocation4] sm:$0xff] %vm357_vm6, %v571_v7  ;;  %v560_v15 = vadd.f32 %v558_v2, %v555_v12  ;;  %v588_v53 = vmul.f32 %v1442_v51, %v571_v7 }
 0x15c   : > { %585 = vst.msk [vmem:[#allocation6] sm:$0xff] %vm357_vm6, %v581_v14  ;;  %1028 = vrsqrt.f32 %v581_v14  ;;  %v564_v18 = vadd.f32 %v562_v13, %v560_v15  ;;  %vm597_vm4 = vcmp.eq.f32.partialorder %v581_v14, inf  ;;  %v600_v37 = vand.u32 2147483648, %v581_v14 }
 0x15d   : > { %vm599_vm5 = vcmp.eq.f32.partialorder %v581_v14, 0.0 }
 0x15e   : > { %v570_v20 = vmul.f32 0.1, %v564_v18  ;;  %v578_v22 = vmul.f32 0.001, %v564_v18 }
 0x160   : > { %v572_v25 = vadd.f32 %v570_v20, %v568_v19  ;;  %v580_v26 = vmul.f32 %v578_v22, %v564_v18 }
 0x162   : > { %v1029_v27 = vpop.eup %1028  ;;  %v582_v29 = vadd.f32 %v580_v26, %v576_v21  ;;  %584 = vst.msk [vmem:[#allocation4 + $0x8] sm:$0xff] %vm357_vm6, %v572_v25  ;;  %v589_v59 = vmul.f32 %v1442_v51, %v572_v25 }
 0x163   : > { %v591_v28 = vmul.f32 %v1029_v27, %v581_v14 }
 0x164   : > { %586 = vst.msk [vmem:[#allocation6 + $0x8] sm:$0xff] %vm357_vm6, %v582_v29  ;;  %1030 = vrsqrt.f32 %v582_v29  ;;  %vm609_vm7 = vcmp.eq.f32.partialorder %v582_v29, inf  ;;  %v612_v9 = vand.u32 2147483648, %v582_v29  ;;  %vm611_vm8 = vcmp.eq.f32.partialorder %v582_v29, 0.0 }
 0x165   : > { %v592_v30 = vmul.f32 %v1029_v27, %v591_v28 }
 0x167   : > { %v593_v31 = vmul.f32 0.5, %v592_v30 }
 0x169   : > { %v594_v32 = vsub.f32 1.5, %v593_v31 }
 0x16a   : > { %v1031_v33 = vpop.eup %1030 }
 0x16b   : > { %v595_v34 = vmul.f32 %v1029_v27, %v594_v32  ;;  %v603_v35 = vmul.f32 %v1031_v33, %v582_v29 }
 0x16d   : > { %v596_v36 = vmul.f32 %v595_v34, %v581_v14  ;;  %v604_v41 = vmul.f32 %v1031_v33, %v603_v35 }
 0x16f   : > { %v598_v42 = vsel %vm597_vm4, %v581_v14, %v596_v36  ;;  %v605_v44 = vmul.f32 0.5, %v604_v41 }
 0x170   : > { %v601_v43 = vsel %vm599_vm5, %v600_v37, %v598_v42 }
 0x171   : > { %v615_v45 = vmul.f32 %v1439_v23, %v601_v43  ;;  %v606_v46 = vsub.f32 1.5, %v605_v44 }
 0x173   : > { %v617_v48 = vadd.f32 1e-08, %v615_v45  ;;  %v607_v49 = vmul.f32 %v1031_v33, %v606_v46 }
 0x175   : > { %1032 = vrcp.f32 %v617_v48  ;;  %v608_v50 = vmul.f32 %v607_v49, %v582_v29 }
 0x177   : > { %v610_v52 = vsel %vm609_vm7, %v582_v29, %v608_v50 }
 0x178   : > { %v613_v8 = vsel %vm611_vm8, %v612_v9, %v610_v52 }
 0x179   : > { %v616_v54 = vmul.f32 %v1439_v23, %v613_v8 }
 0x17b   : > { %v1033_v55 = vpop.eup %1032  ;;  %v618_v57 = vadd.f32 1e-08, %v616_v54 }
 0x17c   : > { %v621_v56 = vmul.f32 %v1033_v55, %v588_v53 }
 0x17d   : > { %1034 = vrcp.f32 %v618_v57 }
 0x17e   : > { %v623_v10 = vsub.f32 %v1391_v39, %v621_v56 }
 0x180   : > { %625 = vst.msk [vmem:[#allocation2] sm:$0xff] %vm357_vm6, %v623_v10 }
 0x183   : > { %v1035_v60 = vpop.eup %1034 }
 0x184   : > { %v622_v61 = vmul.f32 %v1035_v60, %v589_v59  ;;  %629 = sbr.rel (%p921_p1) target bundleno = 395 (0x18b), region = 55 }
 0x186   : > { %v624_v62 = vsub.f32 %v1384_v24, %v622_v61 }
 0x188   : > { %626 = vst.msk [vmem:[#allocation2 + $0x8] sm:$0xff] %vm357_vm6, %v624_v62 }
 0x189   : > { %630 = vst.msk [vmem:[%s1291_s30] sm:$0xff] %vm357_vm6, %v623_v10 }
 0x18a   : > { %631 = vst.msk [vmem:[%s1291_s30 + $0x8] sm:$0xff] %vm357_vm6, %v624_v62 }
 0x18b PF: > { %v1458_v39 = vld [vmem:[#allocation3 + $0x8] sm:$0xff]  ;;  %679 = vmatpush.msra.mxu3 %v1389_v38  ;;  %v1461_v63 = vld [vmem:[#allocation3] sm:$0xff]  ;;  %v632_v24 = vld [vmem:[#allocation10] sm:$0xff] }
 0x18c   : > { %650 = vmatpush.msra.mxu2 %v1458_v39  ;;  %v688_v0 = vmul.f32 %v632_v24, %v1425_v47  ;;  %v692_v2 = vmul.f32 0.001, %v1461_v63  ;;  %v696_v3 = vld [vmem:[#allocation5] sm:$0xff]  ;;  %v633_v11 = vld [vmem:[#allocation10 + $0x8] sm:$0xff]  ;;  %v693_v20 = vmul.f32 0.001, %v1458_v39 }
 0x18d   : > { %680 = vmatpush.msra.mxu3 %v1398_v40  ;;  %v704_v7 = vld [vmem:[#allocation7] sm:$0xff]  ;;  %v697_v25 = vld [vmem:[#allocation5 + $0x8] sm:$0xff] }
 0x18e   : > { %651 = vmatpush.msra.mxu2 %v1461_v63  ;;  %924 = vmatmul.msk.f32.vlgmr.msra.gmra.mxu3 %vm357_vm6, %v1461_v63  ;;  %v706_v14 = vmul.f32 0.999, %v704_v7  ;;  %v705_v26 = vld [vmem:[#allocation7 + $0x8] sm:$0xff]  ;;  %v699_v28 = vmul.f32 0.9, %v697_v25 }
 0x18f   : > { %922 = vmatmul.msk.f32.vlgmr.msra.gmra.mxu2 %vm357_vm6, %v1403_v5  ;;  %v698_v5 = vmul.f32 0.9, %v696_v3  ;;  %v707_v30 = vmul.f32 0.999, %v705_v26 }
 0x196   : > { %925 = vmatmul.msk.f32.gmra.mxu3 %vm357_vm6, %v1458_v39 }
 0x197   : > { %923 = vmatmul.msk.f32.gmra.mxu2 %vm357_vm6, %v1414_v6  ;;  %v689_v6 = vmul.f32 %v633_v11, %v1430_v58 }
 0x211   : > { %v682_v38 = vpop.f32.mrf.mxu3 }
 0x212   : > { %v653_v1 = vpop.f32.mrf.mxu2 }
 0x213   : > { %v683_v40 = vadd.f32 %v682_v38, %v653_v1 }
 0x215   : > { %v690_v4 = vadd.f32 %v688_v0, %v683_v40 }
 0x217   : > { %v694_v12 = vadd.f32 %v692_v2, %v690_v4 }
 0x219   : > { %v700_v13 = vmul.f32 0.1, %v694_v12  ;;  %v708_v15 = vmul.f32 0.001, %v694_v12  ;;  %v685_v16 = vpop.f32.mrf.mxu3 }
 0x21a   : > { %v656_v17 = vpop.f32.mrf.mxu2 }
 0x21b   : > { %v702_v18 = vadd.f32 %v700_v13, %v698_v5  ;;  %v710_v19 = vmul.f32 %v708_v15, %v694_v12  ;;  %v686_v47 = vadd.f32 %v685_v16, %v656_v17 }
 0x21d   : > { %v712_v21 = vadd.f32 %v710_v19, %v706_v14  ;;  %714 = vst.msk [vmem:[#allocation5] sm:$0xff] %vm357_vm6, %v702_v18  ;;  %v691_v22 = vadd.f32 %v689_v6, %v686_v47  ;;  %v718_v59 = vmul.f32 %v702_v18, %v1442_v51 }
 0x21f   : > { %716 = vst.msk [vmem:[#allocation7] sm:$0xff] %vm357_vm6, %v712_v21  ;;  %1036 = vrsqrt.f32 %v712_v21  ;;  %v695_v27 = vadd.f32 %v693_v20, %v691_v22  ;;  %vm727_vm9 = vcmp.eq.f32.partialorder %v712_v21, inf  ;;  %v730_v46 = vand.u32 2147483648, %v712_v21 }
 0x220   : > { %vm729_vm10 = vcmp.eq.f32.partialorder %v712_v21, 0.0 }
 0x221   : > { %v701_v29 = vmul.f32 0.1, %v695_v27  ;;  %v709_v58 = vmul.f32 0.001, %v695_v27 }
 0x223   : > { %v703_v31 = vadd.f32 %v701_v29, %v699_v28  ;;  %v711_v32 = vmul.f32 %v709_v58, %v695_v27 }
 0x225   : > { %v1037_v33 = vpop.eup %1036  ;;  %v713_v35 = vadd.f32 %v711_v32, %v707_v30  ;;  %715 = vst.msk [vmem:[#allocation5 + $0x8] sm:$0xff] %vm357_vm6, %v703_v31  ;;  %v719_v0 = vmul.f32 %v703_v31, %v1442_v51 }
 0x226   : > { %v721_v34 = vmul.f32 %v1037_v33, %v712_v21 }
 0x227   : > { %717 = vst.msk [vmem:[#allocation7 + $0x8] sm:$0xff] %vm357_vm6, %v713_v35  ;;  %1038 = vrsqrt.f32 %v713_v35  ;;  %vm739_vm11 = vcmp.eq.f32.partialorder %v713_v35, inf  ;;  %v742_v56 = vand.u32 2147483648, %v713_v35  ;;  %vm741_vm12 = vcmp.eq.f32.partialorder %v713_v35, 0.0 }
 0x228   : > { %v722_v36 = vmul.f32 %v1037_v33, %v721_v34 }
 0x22a   : > { %v723_v37 = vmul.f32 0.5, %v722_v36 }
 0x22c   : > { %v724_v41 = vsub.f32 1.5, %v723_v37 }
 0x22d   : > { %v1039_v42 = vpop.eup %1038 }
 0x22e   : > { %v725_v43 = vmul.f32 %v1037_v33, %v724_v41  ;;  %v733_v44 = vmul.f32 %v1039_v42, %v713_v35 }
 0x230   : > { %v726_v45 = vmul.f32 %v725_v43, %v712_v21  ;;  %v734_v48 = vmul.f32 %v1039_v42, %v733_v44 }
 0x232   : > { %v728_v49 = vsel %vm727_vm9, %v712_v21, %v726_v45  ;;  %v735_v9 = vmul.f32 0.5, %v734_v48 }
 0x233   : > { %v731_v50 = vsel %vm729_vm10, %v730_v46, %v728_v49 }
 0x234   : > { %v744_v52 = vmul.f32 %v731_v50, %v1439_v23  ;;  %v736_v8 = vsub.f32 1.5, %v735_v9 }
 0x236   : > { %v746_v53 = vadd.f32 1e-08, %v744_v52  ;;  %v737_v54 = vmul.f32 %v1039_v42, %v736_v8 }
 0x238   : > { %1040 = vrcp.f32 %v746_v53  ;;  %v738_v55 = vmul.f32 %v737_v54, %v713_v35 }
 0x23a   : > { %v740_v57 = vsel %vm739_vm11, %v713_v35, %v738_v55 }
 0x23b   : > { %v743_v10 = vsel %vm741_vm12, %v742_v56, %v740_v57 }
 0x23c   : > { %v745_v60 = vmul.f32 %v743_v10, %v1439_v23 }
 0x23e   : > { %v1041_v61 = vpop.eup %1040  ;;  %v747_v24 = vadd.f32 1e-08, %v745_v60 }
 0x23f   : > { %v750_v62 = vmul.f32 %v1041_v61, %v718_v59 }
 0x240   : > { %1042 = vrcp.f32 %v747_v24 }
 0x241   : > { %v752_v38 = vsub.f32 %v1461_v63, %v750_v62 }
 0x243   : > { %754 = vst.msk [vmem:[#allocation3] sm:$0xff] %vm357_vm6, %v752_v38 }
 0x246   : > { %v1043_v1 = vpop.eup %1042 }
 0x247   : > { %v751_v40 = vmul.f32 %v1043_v1, %v719_v0  ;;  %758 = sbr.rel (%p921_p1) target bundleno = 590 (0x24e), region = 59 }
 0x249   : > { %v753_v2 = vsub.f32 %v1458_v39, %v751_v40 }
 0x24b   : > { %755 = vst.msk [vmem:[#allocation3 + $0x8] sm:$0xff] %vm357_vm6, %v753_v2 }
 0x24c   : > { %927 = vst.msk [vmem:[%s1291_s30 + $0x10] sm:$0xff] %vm357_vm6, %v752_v38 }
 0x24d   : > { %928 = vst.msk [vmem:[%s1291_s30 + $0x18] sm:$0xff] %vm357_vm6, %v753_v2 }
 0x24e PF: > { %s938_s20 = sshll.u32 %s1144_s29, 5  ;;  %s775_s24 = sshll.u32 %s1291_s30, 4  ;;  %s776_s24 = int_to_ptr.vmem [resolvable:$true] %s775_s24 }
 0x24f   : > { %s774_s23 = scalar_lea.hbm %s1547_s6, %s938_s20  ;;  %s763_s8 = scalar_lea.sflag [#allocation14], %s266_s17 }
 0x250   : > { %s777_s28 = sshll.u32 %s774_s23, 4  ;;  %s1076_s29 = scalar_lea.hbm %s1547_s6, 64  ;;  %s778_s28 = int_to_ptr.hbm [resolvable:$true] %s777_s28 }
 0x251   : > { %s1070_s9 = sshra.s32 %s778_s28, 4  ;;  %s1071_s9 = int_to_ptr.hbm [resolvable:$true] %s1070_s9 }
 0x252   : > { %s1072_s15 = scalar_lea.hbm %s1071_s9, 32  ;;  %p1077_p6 = scmp.lt.s32.totalorder %s1071_s9, %s1547_s6 }
 0x253   : > { %p1073_p2 = scmp.ne.s32.totalorder %s1071_s9, %s1072_s15  ;;  %p1078_p7 = scmp.lt.s32.totalorder %s1076_s29, %s1072_s15 }
 0x255   : > { %p1074_p4 = pnand %p1073_p2, %p1255_p3  ;;  %p1079_p8 = por %p1078_p7, %p1077_p6 }
 0x257   : > { %p1075_p5 = pneg %p1074_p4 }
 0x259   : > { %p1080_p10 = pnand %p1079_p8, %p1075_p5 }
 0x25b   : > { %1083 = shalt.err (!%p1080_p10)
}
 0x25c   : > { %s1166_s30 = smov 128   ;;  %s1167_s17 = smov 8  }
 0x25d   : > { %943 = dma.vmem_to_hbm [thread:$0]  (%p1255_p3), %s776_s24, 512, %s778_s28, %s763_s8, %s1166_s30, %s1166_s30, %s1167_s17  }
 0x25e PF: > { %p949_p11 = scmp.ge.s32.totalorder %s1156_s7, 2  ;;  %s792_s18 = sand.u32 1, %s1128_s25  }
 0x25f   : > { %s793_s19 = scalar_lea.sflag [#allocation14], %s792_s18 }
 0x260   : > { %p946_p12 = pnand %p949_p11, %p1265_p9 }
 0x262   : > { %p947_p13 = pneg %p946_p12 }
 0x264   : > { %1123 = dma.done.wait (%p947_p13), %s793_s19, 512  }
 0x265   : > { %1125 = vsyncadd (%p947_p13), %s793_s19, 4294966784  ;;  %s27_s7 = sadd.s32 1, %s1156_s7   ;;  %s1565_s28 = sld [smem:[#allocation17_spill]] }
 0x266   : > { %p24_p0 = scmp.ge.s32.totalorder %s27_s7, 12   ;;  %s1566_s29 = sld [smem:[#allocation18_spill]] }
 0x267   : > { %s1567_s30 = sld [smem:[#allocation19_spill]]  ;;  %s1569_s25 = smov %s1132_s26 }
 0x268   : > { %s1568_s0 = sld [smem:[#allocation20_spill]]  ;;  %s1570_s26 = smov %s1136_s27 }
 0x269   : > { %s1571_s27 = smov %s1273_s16  ;;  %26 = sbr.rel (!%p24_p0) target bundleno = 11 (0xb), region = 118 }
 0x26e   :  { %799 = vsyncpa [#allocation14], 1 }
 0x26f   :  { %801 = vsyncpa [#allocation14 + $0x1], 1 }

</bundles_post_ra>
